<compile_context>
chip_gen: v7x
topology: tpu7x:2x2x1
jax: 0.10.0
libtpu: 0.0.40
codegen_flags: <defaults>
</compile_context>

<pallas_src>
import functools

import jax
import jax.numpy as jnp
from jax.experimental import pallas as pl
from jax.experimental.pallas import tpu as pltpu

_NEG_BIG = -1e30  # "minus infinity" whose exp() underflows to exactly 0.0


def _round_up(x, m):
    return (x + m - 1) // m * m


def _cdiv(a, b):
    return (a + b - 1) // b


def _physical_vmem_bytes():
    """Physical VMEM of the local TPU; conservative 64 MiB (v7x) fallback."""
    try:
        info = pltpu.get_tpu_info()
        for attr in ("vmem_capacity_bytes", "vmem_bytes", "vmem_size_bytes"):
            v = getattr(info, attr, None)
            if v:
                return int(v)
    except Exception:
        pass
    return 64 << 20


def _estimate_vmem(tm, tn, D, in_bytes, logits_bytes, want_logits):
    """VMEM bytes for one grid step, including double buffering and the
    (x, 1) -> (x, 128) lane padding of narrow refs (labels / loss / scratch)."""
    lane = 128
    est = 2 * tm * D * in_bytes            # x rows (double buffered)
    est += 2 * tn * D * in_bytes           # weight tile (double buffered)
    est += 2 * 8 * tn * 4                  # bias (1, tn), sublane padded
    est += 2 * tm * lane * 4               # labels (tm, 1), lane padded
    est += 2 * tm * lane * 4               # per-row loss output
    if want_logits:
        est += 2 * tm * tn * logits_bytes  # logits tile output
    est += 4 * tm * lane * 4               # four f32 (tm, 1) scratches
    return est


_TM_CANDIDATES = (1024, 768, 512, 384, 256, 192, 128, 64, 32, 16, 8)


def _select_tiles(N, V, D, in_bytes, logits_bytes, want_logits, budget,
                  tm=None, tn=None):
    n_cap = max(8, _round_up(N, 8))
    if tn is not None:
        tn_candidates = [max(128, min(_round_up(tn, 128), _round_up(V, 128)))]
    elif V <= 512:
        tn_candidates = [V]                      # one exact vocab tile
    else:
        tn_candidates = [512, 256, 128]

    if tm is not None:
        return max(8, min(_round_up(tm, 8), n_cap)), tn_candidates[0]

    for tn_try in tn_candidates:
        for tm_try in _TM_CANDIDATES:
            tm_try = min(tm_try, n_cap)
            if _estimate_vmem(tm_try, tn_try, D, in_bytes, logits_bytes,
                              want_logits) <= budget:
                # Keep >=2 row blocks so the v7x megacore "parallel" axis can
                # feed both TensorCores.
                if N > 512 and _cdiv(N, tm_try) < 2:
                    tm_try = max(8, _round_up(_cdiv(N, 2), 8))
                return tm_try, tn_try
    return min(64, n_cap), tn_candidates[-1]    # last resort: tiny tiles


def _pred_body(x_ref, w_ref, b_ref, y_ref, logits_ref, loss_ref,
               m_scr, l_scr, lab_scr, s_scr,
               *, vocab_size, tn, p_coef, q_coef, mask_vocab):
    # x_ref: (tm, D) compute dtype | w_ref: (tn, D) compute dtype (native
    # nn.Linear layout) | b_ref: (1, tn) f32 | y_ref: (tm, 1) i32
    # logits_ref: (tm, tn) or None | loss_ref: (tm, 1) f32
    j = pl.program_id(1)
    nj = pl.num_programs(1)

    @pl.when(j == 0)
    def _():
        m_scr[...] = jnp.full_like(m_scr, -jnp.inf)
        l_scr[...] = jnp.zeros_like(l_scr)
        lab_scr[...] = jnp.zeros_like(lab_scr)
        if q_coef != 0.0:
            s_scr[...] = jnp.zeros_like(s_scr)

    # (tm, D) x (tn, D) -> (tm, tn): contract D of both operands (transposed-
    # RHS MXU feed, no weight transpose materialized), f32 accumulation.
    logits = jax.lax.dot_general(
        x_ref[...], w_ref[...], (((1,), (1,)), ((), ())),
        preferred_element_type=jnp.float32) + b_ref[...].astype(jnp.float32)

    if logits_ref is not None:
        logits_ref[...] = logits.astype(logits_ref.dtype)

    # Global column index of each lane (label match + vocab-padding mask).
    col = jax.lax.broadcasted_iota(jnp.int32, logits.shape, 1) + j * tn

    if mask_vocab:                      # only emitted when V % tn != 0
        valid = col < vocab_size
        masked = jnp.where(valid, logits, jnp.float32(_NEG_BIG))
    else:
        masked = logits

    # --- online softmax statistics (one exp pass; padded columns underflow
    # to exactly 0 via exp(-1e30 - m_new), no second select needed) ---
    m_prev = m_scr[...]
    m_new = jnp.maximum(m_prev, jnp.max(masked, axis=-1, keepdims=True))
    alpha = jnp.exp(m_prev - m_new)                       # 0 at j == 0
    p = jnp.exp(masked - m_new)
    l_scr[...] = alpha * l_scr[...] + jnp.sum(p, axis=-1, keepdims=True)
    m_scr[...] = m_new

    # --- label logit via one-hot compare (labels are always valid columns) ---
    y = y_ref[...]
    lab_scr[...] += jnp.sum(jnp.where(col == y, logits, 0.0),
                            axis=-1, keepdims=True)

    if q_coef != 0.0:                   # label smoothing needs sum_j logits_j
        s_val = jnp.where(valid, logits, 0.0) if mask_vocab else logits
        s_scr[...] += jnp.sum(s_val, axis=-1, keepdims=True)

    @pl.when(j == nj - 1)
    def _():
        lse = jnp.log(l_scr[...]) + m_scr[...]            # (tm, 1)
        label_logp = lab_scr[...] - lse
        if q_coef != 0.0:
            # loss_i = -((p - q) * logp[label] + q * sum_j logp[j])
            sum_logp = s_scr[...] - float(vocab_size) * lse
            loss = -((p_coef - q_coef) * label_logp + q_coef * sum_logp)
        else:
            loss = -label_logp
        loss_ref[...] = loss


def pred_layer_forward(x, y, weight, bias, *, label_smoothing=0.0,
                       tm=None, tn=None,
                       compute_dtype=jnp.bfloat16,
                       logits_dtype=None,
                       return_logits=True):
    """
    x:      (..., D) activations (flattened to (N, D))
    y:      (N,)     int labels (module asserts none equal pad_index)
    weight: (V, D)   nn.Linear weight (native layout; pass bf16 weights to
                     avoid the wrapper-side cast)
    bias:   (V,)
    Returns (logits (N, V) logits_dtype, scalar mean loss) matching
    PredLayer.forward, or just the loss when return_logits=False.
    """
    D = x.shape[-1]
    V = weight.shape[0]
    x2 = x.reshape(-1, D)
    N = x2.shape[0]

    compute_dtype = jnp.dtype(compute_dtype)
    logits_dtype = jnp.dtype(compute_dtype if logits_dtype is None
                             else logits_dtype)

    x2 = x2.astype(compute_dtype)
    w = weight.astype(compute_dtype)
    b2 = bias.astype(jnp.float32).reshape(1, V)
    y2 = y.reshape(-1, 1).astype(jnp.int32)

    if label_smoothing:
        p_coef = 1.0 - float(label_smoothing)
        q_coef = float(label_smoothing) / float(V - 1)
    else:
        p_coef, q_coef = 1.0, 0.0

    in_bytes = compute_dtype.itemsize
    logits_bytes = logits_dtype.itemsize
    phys = _physical_vmem_bytes()
    tm, tn = _select_tiles(N, V, D, in_bytes, logits_bytes, return_logits,
                           budget=int(phys * 0.55), tm=tm, tn=tn)

    mask_vocab = (V % tn) != 0
    grid = (_cdiv(N, tm), _cdiv(V, tn))

    est = _estimate_vmem(tm, tn, D, in_bytes, logits_bytes, return_logits)
    vmem_limit = int(min(phys * 0.9, max(est * 1.5 + (8 << 20), 32 << 20)))

    in_specs = [
        pl.BlockSpec((tm, D), lambda i, j: (i, 0)),   # x rows (resident over j)
        pl.BlockSpec((tn, D), lambda i, j: (j, 0)),   # weight tile
        pl.BlockSpec((1, tn), lambda i, j: (0, j)),   # bias tile
        pl.BlockSpec((tm, 1), lambda i, j: (i, 0)),   # labels
    ]
    loss_spec = pl.BlockSpec((tm, 1), lambda i, j: (i, 0))

    if return_logits:
        kernel = functools.partial(
            _pred_body, vocab_size=V, tn=tn, p_coef=p_coef, q_coef=q_coef,
            mask_vocab=mask_vocab)
        out_shape = (jax.ShapeDtypeStruct((N, V), logits_dtype),
                     jax.ShapeDtypeStruct((N, 1), jnp.float32))
        out_specs = [pl.BlockSpec((tm, tn), lambda i, j: (i, j)), loss_spec]
    else:
        def kernel(x_ref, w_ref, b_ref, y_ref, loss_ref,
                   m_scr, l_scr, lab_scr, s_scr):
            _pred_body(x_ref, w_ref, b_ref, y_ref, None, loss_ref,
                       m_scr, l_scr, lab_scr, s_scr,
                       vocab_size=V, tn=tn, p_coef=p_coef, q_coef=q_coef,
                       mask_vocab=mask_vocab)
        out_shape = jax.ShapeDtypeStruct((N, 1), jnp.float32)
        out_specs = loss_spec

    result = pl.pallas_call(
        kernel,
        out_shape=out_shape,
        grid_spec=pltpu.PrefetchScalarGridSpec(
            num_scalar_prefetch=0,
            grid=grid,                                   # (rows, vocab)
            in_specs=in_specs,
            out_specs=out_specs,
            scratch_shapes=[pltpu.VMEM((tm, 1), jnp.float32)] * 4),
        compiler_params=pltpu.CompilerParams(
            dimension_semantics=("parallel", "arbitrary"),
            vmem_limit_bytes=vmem_limit),
    )(x2, w, b2, y2)

    if return_logits:
        logits, per_row = result
        loss = jnp.sum(per_row[:, 0]) / N
        return logits, loss
    per_row = result
    return jnp.sum(per_row[:, 0]) / N


def _reference(x, y, weight, bias, label_smoothing=0.0):
    D = x.shape[-1]
    V = weight.shape[0]
    logits = x.reshape(-1, D) @ weight.T + bias
    logp = jax.nn.log_softmax(logits, axis=-1)
    n = logits.shape[0]
    if not label_smoothing:
        loss = -jnp.mean(logp[jnp.arange(n), y])
    else:
        p = 1.0 - label_smoothing
        q = label_smoothing / (V - 1)
        soft = jnp.full((n, V), q).at[jnp.arange(n), y].set(p)
        loss = jnp.sum(-(soft * logp).sum(axis=1)) / n
    return logits, loss


if __name__ == "__main__":
    key = jax.random.PRNGKey(0)
    k_x, k_w, k_b, k_y, k_x2, k_w2, k_b2, k_y2 = jax.random.split(key, 8)

    # ----- case 1: tiny shapes matching the module defaults ------------------
    batch, seq, dim, vocab = 2, 8, 32, 32
    smoothing = 0.1
    x = jax.random.normal(k_x, (batch, seq, dim), dtype=jnp.float32)
    w = jax.random.normal(k_w, (vocab, dim), dtype=jnp.float32) * 0.1
    b = jax.random.normal(k_b, (vocab,), dtype=jnp.float32) * 0.1
    # labels drawn from 1..V-1 so the module's pad_index==0 assert would hold
    y = jax.random.randint(k_y, (batch * seq,), 1, vocab, dtype=jnp.int32)

    ref_logits, ref_loss = _reference(x, y, w, b, smoothing)

    # f32 path, label smoothing on — bit-accurate check
    logits, loss = pred_layer_forward(x, y, w, b, label_smoothing=smoothing,
                                      compute_dtype=jnp.float32)
    jax.block_until_ready((logits, loss))
    assert logits.shape == (batch * seq, vocab)
    assert jnp.allclose(logits, ref_logits, atol=1e-4, rtol=1e-4)
    assert jnp.allclose(loss, ref_loss, atol=1e-5, rtol=1e-5)

    # f32 path, plain cross-entropy (mean reduction)
    _, ref_loss0 = _reference(x, y, w, b, 0.0)
    _, loss0 = pred_layer_forward(x, y, w, b, label_smoothing=0.0,
                                  compute_dtype=jnp.float32)
    jax.block_until_ready(loss0)
    assert jnp.allclose(loss0, ref_loss0, atol=1e-5, rtol=1e-5)

    # default fast path: bf16 operands + bf16 logits — tolerance check
    logits_bf, loss_bf = pred_layer_forward(x, y, w, b,
                                            label_smoothing=smoothing)
    jax.block_until_ready((logits_bf, loss_bf))
    assert logits_bf.dtype == jnp.bfloat16
    assert jnp.allclose(logits_bf.astype(jnp.float32), ref_logits,
                        atol=7e-2, rtol=7e-2)
    assert jnp.allclose(loss_bf, ref_loss, atol=5e-2, rtol=5e-2)

    # loss-only path (skips the (N, V) logits writeback entirely)
    loss_only = pred_layer_forward(x, y, w, b, label_smoothing=smoothing,
                                   compute_dtype=jnp.float32,
                                   return_logits=False)
    jax.block_until_ready(loss_only)
    assert jnp.allclose(loss_only, ref_loss, atol=1e-5, rtol=1e-5)

    # ----- case 2: ragged shapes (N % 8 != 0, V % tn != 0, multiple vocab
    # tiles) exercising the unpadded partial-block / masking path -------------
    batch2, seq2, dim2, vocab2 = 2, 7, 64, 200
    x2 = jax.random.normal(k_x2, (batch2, seq2, dim2), dtype=jnp.float32)
    w2 = jax.random.normal(k_w2, (vocab2, dim2), dtype=jnp.float32) * 0.1
    b2 = jax.random.normal(k_b2, (vocab2,), dtype=jnp.float32) * 0.1
    y2 = jax.random.randint(k_y2, (batch2 * seq2,), 1, vocab2, dtype=jnp.int32)

    ref_logits2, ref_loss2 = _reference(x2, y2, w2, b2, smoothing)
    logits2, loss2 = pred_layer_forward(x2, y2, w2, b2,
                                        label_smoothing=smoothing,
                                        compute_dtype=jnp.float32, tn=128)
    jax.block_until_ready((logits2, loss2))
    assert logits2.shape == (batch2 * seq2, vocab2)
    assert jnp.allclose(logits2, ref_logits2, atol=1e-4, rtol=1e-4)
    assert jnp.allclose(loss2, ref_loss2, atol=1e-5, rtol=1e-5)

    print("KERNEL_OK")
</pallas_src>

<mosaic_0001>
module attributes {stable_mosaic.version = 11 : i64} {
  func.func @_pred_body(%arg0: i32, %arg1: i32, %arg2: memref<16x32xf32, #tpu.memory_space<vmem>>, %arg3: memref<32x32xf32, #tpu.memory_space<vmem>>, %arg4: memref<1x32xf32, #tpu.memory_space<vmem>>, %arg5: memref<16x1xi32, #tpu.memory_space<vmem>>, %arg6: memref<16x32xf32, #tpu.memory_space<vmem>>, %arg7: memref<16x1xf32, #tpu.memory_space<vmem>>, %arg8: memref<16x1xf32, #tpu.memory_space<vmem>>, %arg9: memref<16x1xf32, #tpu.memory_space<vmem>>, %arg10: memref<16x1xf32, #tpu.memory_space<vmem>>, %arg11: memref<16x1xf32, #tpu.memory_space<vmem>>) attributes {dimension_semantics = [#tpu.dimension_semantics<parallel>, #tpu.dimension_semantics<arbitrary>], iteration_bounds = array<i64: 1, 1>, scalar_prefetch = 0 : i64, scratch_operands = 4 : i64, tpu.core_type = #tpu.core_type<tc>, window_params = [{transform_indices = @transform_0, window_bounds = array<i64: 16, 32>}, {transform_indices = @transform_1, window_bounds = array<i64: 32, 32>}, {transform_indices = @transform_2, window_bounds = array<i64: 1, 32>}, {transform_indices = @transform_3, window_bounds = array<i64: 16, 1>}, {transform_indices = @transform_4, window_bounds = array<i64: 16, 32>}, {transform_indices = @transform_5, window_bounds = array<i64: 16, 1>}]} {
    %c0_i32 = arith.constant 0 : i32
    %0 = arith.cmpi eq, %arg1, %c0_i32 : i32
    %1 = arith.extui %0 : i1 to i32
    %c0_i32_0 = arith.constant 0 : i32
    %2 = arith.cmpi ne, %1, %c0_i32_0 : i32
    scf.if %2 {
      %cst_33 = arith.constant 0xFF800000 : f32
      %48 = vector.broadcast %cst_33 : f32 to vector<16x1xf32>
      %c0_34 = arith.constant 0 : index
      %c0_35 = arith.constant 0 : index
      %49 = vector.load %arg8[%c0_34, %c0_35] : memref<16x1xf32, #tpu.memory_space<vmem>>, vector<16x1xf32>
      tpu.vector_store %arg8[%c0_34, %c0_35], %48 {strides = array<i32>} : memref<16x1xf32, #tpu.memory_space<vmem>>, vector<16x1xf32>,
      %cst_36 = arith.constant 0.000000e+00 : f32
      %50 = vector.broadcast %cst_36 : f32 to vector<16x1xf32>
      %c0_37 = arith.constant 0 : index
      %c0_38 = arith.constant 0 : index
      %51 = vector.load %arg9[%c0_37, %c0_38] : memref<16x1xf32, #tpu.memory_space<vmem>>, vector<16x1xf32>
      tpu.vector_store %arg9[%c0_37, %c0_38], %50 {strides = array<i32>} : memref<16x1xf32, #tpu.memory_space<vmem>>, vector<16x1xf32>,
      %cst_39 = arith.constant 0.000000e+00 : f32
      %52 = vector.broadcast %cst_39 : f32 to vector<16x1xf32>
      %c0_40 = arith.constant 0 : index
      %c0_41 = arith.constant 0 : index
      %53 = vector.load %arg10[%c0_40, %c0_41] : memref<16x1xf32, #tpu.memory_space<vmem>>, vector<16x1xf32>
      tpu.vector_store %arg10[%c0_40, %c0_41], %52 {strides = array<i32>} : memref<16x1xf32, #tpu.memory_space<vmem>>, vector<16x1xf32>,
      %cst_42 = arith.constant 0.000000e+00 : f32
      %54 = vector.broadcast %cst_42 : f32 to vector<16x1xf32>
      %c0_43 = arith.constant 0 : index
      %c0_44 = arith.constant 0 : index
      %55 = vector.load %arg11[%c0_43, %c0_44] : memref<16x1xf32, #tpu.memory_space<vmem>>, vector<16x1xf32>
      tpu.vector_store %arg11[%c0_43, %c0_44], %54 {strides = array<i32>} : memref<16x1xf32, #tpu.memory_space<vmem>>, vector<16x1xf32>,
    } else {
    }
    %c0 = arith.constant 0 : index
    %c0_1 = arith.constant 0 : index
    %3 = vector.load %arg2[%c0, %c0_1] : memref<16x32xf32, #tpu.memory_space<vmem>>, vector<16x32xf32>
    %c0_2 = arith.constant 0 : index
    %c0_3 = arith.constant 0 : index
    %4 = vector.load %arg3[%c0_2, %c0_3] : memref<32x32xf32, #tpu.memory_space<vmem>>, vector<32x32xf32>
    %cst = arith.constant dense<0.000000e+00> : vector<16x32xf32>
    %5 = tpu.matmul %3, %4, %cst {dimension_numbers = #tpu.dot_dimension_numbers<[1], [1], [0], [0], [0, 0, 1, 0], [], []>} : vector<16x32xf32>, vector<32x32xf32>, vector<16x32xf32> -> vector<16x32xf32>
    %c0_4 = arith.constant 0 : index
    %c0_5 = arith.constant 0 : index
    %6 = vector.load %arg4[%c0_4, %c0_5] : memref<1x32xf32, #tpu.memory_space<vmem>>, vector<1x32xf32>
    %7 = vector.broadcast %6 : vector<1x32xf32> to vector<16x32xf32>
    %8 = arith.addf %5, %7 : vector<16x32xf32>
    %c0_6 = arith.constant 0 : index
    %c0_7 = arith.constant 0 : index
    %9 = vector.load %arg6[%c0_6, %c0_7] : memref<16x32xf32, #tpu.memory_space<vmem>>, vector<16x32xf32>
    tpu.vector_store %arg6[%c0_6, %c0_7], %8 {strides = array<i32>} : memref<16x32xf32, #tpu.memory_space<vmem>>, vector<16x32xf32>,
    %10 = tpu.iota {dimensions = array<i32: 1>} : vector<16x32xi32>
    %c32_i32 = arith.constant 32 : i32
    %11 = arith.muli %arg1, %c32_i32 : i32
    %12 = vector.broadcast %11 : i32 to vector<16x32xi32>
    %13 = arith.addi %10, %12 : vector<16x32xi32>
    %c0_8 = arith.constant 0 : index
    %c0_9 = arith.constant 0 : index
    %14 = vector.load %arg8[%c0_8, %c0_9] : memref<16x1xf32, #tpu.memory_space<vmem>>, vector<16x1xf32>
    %cst_10 = arith.constant dense<0xFF800000> : vector<16xf32>
    %15 = vector.multi_reduction <maximumf>, %8, %cst_10 [1] : vector<16x32xf32> to vector<16xf32>
    %16 = vector.shape_cast %15 : vector<16xf32> to vector<16x1xf32>
    %17 = arith.maximumf %14, %16 : vector<16x1xf32>
    %18 = arith.subf %14, %17 : vector<16x1xf32>
    %19 = math.exp %18 : vector<16x1xf32>
    %20 = vector.broadcast %17 : vector<16x1xf32> to vector<16x32xf32>
    %21 = arith.subf %8, %20 : vector<16x32xf32>
    %22 = math.exp %21 : vector<16x32xf32>
    %c0_11 = arith.constant 0 : index
    %c0_12 = arith.constant 0 : index
    %23 = vector.load %arg9[%c0_11, %c0_12] : memref<16x1xf32, #tpu.memory_space<vmem>>, vector<16x1xf32>
    %24 = arith.mulf %19, %23 : vector<16x1xf32>
    %cst_13 = arith.constant dense<0.000000e+00> : vector<16xf32>
    %25 = vector.multi_reduction <add>, %22, %cst_13 [1] : vector<16x32xf32> to vector<16xf32>
    %26 = vector.shape_cast %25 : vector<16xf32> to vector<16x1xf32>
    %27 = arith.addf %24, %26 : vector<16x1xf32>
    %c0_14 = arith.constant 0 : index
    %c0_15 = arith.constant 0 : index
    %28 = vector.load %arg9[%c0_14, %c0_15] : memref<16x1xf32, #tpu.memory_space<vmem>>, vector<16x1xf32>
    tpu.vector_store %arg9[%c0_14, %c0_15], %27 {strides = array<i32>} : memref<16x1xf32, #tpu.memory_space<vmem>>, vector<16x1xf32>,
    %c0_16 = arith.constant 0 : index
    %c0_17 = arith.constant 0 : index
    %29 = vector.load %arg8[%c0_16, %c0_17] : memref<16x1xf32, #tpu.memory_space<vmem>>, vector<16x1xf32>
    tpu.vector_store %arg8[%c0_16, %c0_17], %17 {strides = array<i32>} : memref<16x1xf32, #tpu.memory_space<vmem>>, vector<16x1xf32>,
    %c0_18 = arith.constant 0 : index
    %c0_19 = arith.constant 0 : index
    %30 = vector.load %arg5[%c0_18, %c0_19] : memref<16x1xi32, #tpu.memory_space<vmem>>, vector<16x1xi32>
    %c0_20 = arith.constant 0 : index
    %c0_21 = arith.constant 0 : index
    %31 = vector.load %arg10[%c0_20, %c0_21] : memref<16x1xf32, #tpu.memory_space<vmem>>, vector<16x1xf32>
    %32 = vector.broadcast %30 : vector<16x1xi32> to vector<16x32xi32>
    %33 = arith.cmpi eq, %13, %32 : vector<16x32xi32>
    %cst_22 = arith.constant 0.000000e+00 : f32
    %34 = vector.broadcast %cst_22 : f32 to vector<16x32xf32>
    %35 = arith.select %33, %8, %34 : vector<16x32xi1>, vector<16x32xf32>
    %cst_23 = arith.constant dense<0.000000e+00> : vector<16xf32>
    %36 = vector.multi_reduction <add>, %35, %cst_23 [1] : vector<16x32xf32> to vector<16xf32>
    %37 = vector.shape_cast %36 : vector<16xf32> to vector<16x1xf32>
    %38 = arith.addf %31, %37 : vector<16x1xf32>
    %c0_24 = arith.constant 0 : index
    %c0_25 = arith.constant 0 : index
    %39 = vector.load %arg10[%c0_24, %c0_25] : memref<16x1xf32, #tpu.memory_space<vmem>>, vector<16x1xf32>
    tpu.vector_store %arg10[%c0_24, %c0_25], %38 {strides = array<i32>} : memref<16x1xf32, #tpu.memory_space<vmem>>, vector<16x1xf32>,
    %c0_26 = arith.constant 0 : index
    %c0_27 = arith.constant 0 : index
    %40 = vector.load %arg11[%c0_26, %c0_27] : memref<16x1xf32, #tpu.memory_space<vmem>>, vector<16x1xf32>
    %cst_28 = arith.constant dense<0.000000e+00> : vector<16xf32>
    %41 = vector.multi_reduction <add>, %8, %cst_28 [1] : vector<16x32xf32> to vector<16xf32>
    %42 = vector.shape_cast %41 : vector<16xf32> to vector<16x1xf32>
    %43 = arith.addf %40, %42 : vector<16x1xf32>
    %c0_29 = arith.constant 0 : index
    %c0_30 = arith.constant 0 : index
    %44 = vector.load %arg11[%c0_29, %c0_30] : memref<16x1xf32, #tpu.memory_space<vmem>>, vector<16x1xf32>
    tpu.vector_store %arg11[%c0_29, %c0_30], %43 {strides = array<i32>} : memref<16x1xf32, #tpu.memory_space<vmem>>, vector<16x1xf32>,
    %c0_i32_31 = arith.constant 0 : i32
    %45 = arith.cmpi eq, %arg1, %c0_i32_31 : i32
    %46 = arith.extui %45 : i1 to i32
    %c0_i32_32 = arith.constant 0 : i32
    %47 = arith.cmpi ne, %46, %c0_i32_32 : i32
    scf.if %47 {
      %c0_33 = arith.constant 0 : index
      %c0_34 = arith.constant 0 : index
      %48 = vector.load %arg9[%c0_33, %c0_34] : memref<16x1xf32, #tpu.memory_space<vmem>>, vector<16x1xf32>
      %49 = math.log %48 : vector<16x1xf32>
      %c0_35 = arith.constant 0 : index
      %c0_36 = arith.constant 0 : index
      %50 = vector.load %arg8[%c0_35, %c0_36] : memref<16x1xf32, #tpu.memory_space<vmem>>, vector<16x1xf32>
      %51 = arith.addf %49, %50 : vector<16x1xf32>
      %c0_37 = arith.constant 0 : index
      %c0_38 = arith.constant 0 : index
      %52 = vector.load %arg10[%c0_37, %c0_38] : memref<16x1xf32, #tpu.memory_space<vmem>>, vector<16x1xf32>
      %53 = arith.subf %52, %51 : vector<16x1xf32>
      %c0_39 = arith.constant 0 : index
      %c0_40 = arith.constant 0 : index
      %54 = vector.load %arg11[%c0_39, %c0_40] : memref<16x1xf32, #tpu.memory_space<vmem>>, vector<16x1xf32>
      %cst_41 = arith.constant 3.200000e+01 : f32
      %55 = vector.broadcast %cst_41 : f32 to vector<16x1xf32>
      %56 = arith.mulf %55, %51 : vector<16x1xf32>
      %57 = arith.subf %54, %56 : vector<16x1xf32>
      %cst_42 = arith.constant 0.896774172 : f32
      %58 = vector.broadcast %cst_42 : f32 to vector<16x1xf32>
      %59 = arith.mulf %58, %53 : vector<16x1xf32>
      %cst_43 = arith.constant 0.0032258064 : f32
      %60 = vector.broadcast %cst_43 : f32 to vector<16x1xf32>
      %61 = arith.mulf %60, %57 : vector<16x1xf32>
      %62 = arith.addf %59, %61 : vector<16x1xf32>
      %cst_44 = arith.constant 0.000000e+00 : f32
      %63 = vector.broadcast %cst_44 : f32 to vector<16x1xf32>
      %64 = arith.subf %63, %62 : vector<16x1xf32>
      %c0_45 = arith.constant 0 : index
      %c0_46 = arith.constant 0 : index
      %65 = vector.load %arg7[%c0_45, %c0_46] : memref<16x1xf32, #tpu.memory_space<vmem>>, vector<16x1xf32>
      tpu.vector_store %arg7[%c0_45, %c0_46], %64 {strides = array<i32>} : memref<16x1xf32, #tpu.memory_space<vmem>>, vector<16x1xf32>,
    } else {
    }
    return
  }
  func.func @transform_0(%arg0: i32, %arg1: i32) -> (i32, i32) {
    %c0_i32 = arith.constant 0 : i32
    %c0_i32_0 = arith.constant 0 : i32
    return %arg0, %c0_i32 : i32, i32
  }
  func.func @transform_1(%arg0: i32, %arg1: i32) -> (i32, i32) {
    %c0_i32 = arith.constant 0 : i32
    %c0_i32_0 = arith.constant 0 : i32
    return %arg1, %c0_i32 : i32, i32
  }
  func.func @transform_2(%arg0: i32, %arg1: i32) -> (i32, i32) {
    %c0_i32 = arith.constant 0 : i32
    %c0_i32_0 = arith.constant 0 : i32
    return %c0_i32, %arg1 : i32, i32
  }
  func.func @transform_3(%arg0: i32, %arg1: i32) -> (i32, i32) {
    %c0_i32 = arith.constant 0 : i32
    %c0_i32_0 = arith.constant 0 : i32
    return %arg0, %c0_i32 : i32, i32
  }
  func.func @transform_4(%arg0: i32, %arg1: i32) -> (i32, i32) {
    %c0_i32 = arith.constant 0 : i32
    return %arg0, %arg1 : i32, i32
  }
  func.func @transform_5(%arg0: i32, %arg1: i32) -> (i32, i32) {
    %c0_i32 = arith.constant 0 : i32
    %c0_i32_0 = arith.constant 0 : i32
    return %arg0, %c0_i32 : i32, i32
  }
}

</mosaic_0001>

<bundles_post_ra>
// kernel: tpu_custom_call.1
= control target key start
LH: loop header
LB: loop body
LE: loop exit
PB: predicated region body
PF: predicated region fallthrough
CT: control target
= control target key end

     0   :  { %11 = vsyncpa [#allocation7], 0  ;;  %s540_s0 = inlined_call_operand.vmem [shape: f32[16,32], index: 0, kind: input, shape index: {}]   ;;  %s541_s1 = inlined_call_operand.hbm [shape: f32[32,32], index: 1, kind: input, shape index: {}]   ;;  %s542_s2 = inlined_call_operand.vmem [shape: f32[1,32], index: 2, kind: input, shape index: {}]   ;;  %s543_s3 = inlined_call_operand.vmem [shape: s32[16,1], index: 3, kind: input, shape index: {}]   ;;  %s544_s4 = inlined_call_operand.hbm [shape: f32[16,32], index: 4, kind: output, shape index: {0}]   ;;  %s545_s5 = inlined_call_operand.vmem [shape: f32[16,1], index: 5, kind: output, shape index: {1}]  }
   0x1   :  { %12 = vsyncpa [#allocation8], 0  ;;  %s405_s18 = smov [#allocation6]   ;;  %s357_s22 = scalar_lea.hbm %s541_s1, 512 }
   0x2   :  { %s20_s19 = sshll.u32 %s405_s18, 4  ;;  %p358_p0 = scmp.ne.s32.totalorder %s541_s1, %s357_s22  ;;  %s21_s19 = int_to_ptr.vmem [resolvable:$true] %s20_s19 }
   0x3   :  { %p361_p1 = scmp.lt.u32.totalorder %s357_s22, %s541_s1 }
   0x5   :  { %p363_p2 = pnand %p361_p1, %p358_p0 }
   0x7   :  { %366 = shalt.err (!%p363_p2)
}
   0x8   :  { %s367_s27 = scalar_lea.vmem %s21_s19, 512  ;;  %p372_p4 = scmp.lt.s32.totalorder %s21_s19, %s21_s19 }
   0x9   :  { %p368_p3 = scmp.ne.s32.totalorder %s21_s19, %s367_s27  ;;  %p373_p5 = scmp.lt.s32.totalorder %s367_s27, %s367_s27 }
   0xb   :  { %p374_p6 = por %p373_p5, %p372_p4 }
   0xd   :  { %p375_p7 = pnand %p374_p6, %p368_p3 }
   0xf   :  { %378 = shalt.err (!%p375_p7)
}
  0x10   :  { %s406_s28 = smov 128   ;;  %s407_s29 = smov 8  }
  0x11   :  { %26 = dma.hbm_to_vmem [thread:$0]  %s541_s1, 512, %s21_s19, [#allocation7], %s406_s28, %s406_s28, %s407_s29  }
  0x12   :  { %401 = dma.done.wait [#allocation7], 512  }
  0x13   :  { %402 = vsyncadd [#allocation7], 4294966784  ;;  %vm60_vm0 = vcmask 261120   ;;  %v49_v0 = vld [vmem:[#allocation6] sm:$0xff]  ;;  %v50_v1 = vld [vmem:[#allocation6 + $0x8] sm:$0xff]  ;;  %v408_v8 = vmov 0   ;;  %v156_v26 = vlaneseq }
  0x14   :  { %vm325_vm1 = vmpackc.low %vm60_vm0, %vm60_vm0  ;;  %v51_v2 = vld [vmem:[#allocation6 + $0x10] sm:$0xff]  ;;  %v324_v3 = vpack.c.bf16 %v50_v1, %v49_v0  ;;  %v52_v4 = vld [vmem:[#allocation6 + $0x18] sm:$0xff]  ;;  %344 = vset.pattern.permute.xlu0 %v408_v8  ;;  %343 = vset.pattern.permute.xlu1 %v408_v8  ;;  %vm38_vm2 = vcmask 7168   ;;  %v409_v9 = vmov -inf   ;;  %v410_v18 = vmov 0.0  }
  0x15   :  { %v47_v5 = vld [vmem:[%s540_s0] sm:$0xff]  ;;  %v330_v6 = vpack.c.bf16 %v52_v4, %v51_v2  ;;  %v48_v7 = vld [vmem:[%s540_s0 + $0x8] sm:$0xff]  ;;  %39 = vst.msk [vmem:[#allocation2] sm:$0xff] %vm38_vm2, %v409_v9  ;;  %40 = vst.msk [vmem:[#allocation2 + $0x8] sm:$0xff] %vm38_vm2, %v409_v9  ;;  %v157_v29 = vand.u32 127, %v156_v26 }
  0x16   :  { %321 = vmatprep.mubr.msk.f32.mxu0 %vm60_vm0, %v47_v5  ;;  %326 = vmatprep.subr.msk.bf16.mxu0 %vm325_vm1, %v324_v3  ;;  %v300_v10 = vld [vmem:[%s542_s2] ss:$0 sm:$0xff]  ;;  %43 = vst.msk [vmem:[#allocation4] sm:$0xff] %vm38_vm2, %v410_v18  ;;  %41 = vst.msk [vmem:[#allocation3] sm:$0xff] %vm38_vm2, %v410_v18  ;;  %v211_v28 = vld [vmem:[%s543_s3 + $0x8] sm:$0xff] }
  0x17   :  { %329 = vmatpush3.bf16.xpose.msk.msra.mxu0 %vm325_vm1, %v324_v3  ;;  %v210_v17 = vld [vmem:[%s543_s3] sm:$0xff]  ;;  %42 = vst.msk [vmem:[#allocation3 + $0x8] sm:$0xff] %vm38_vm2, %v410_v18  ;;  %44 = vst.msk [vmem:[#allocation4 + $0x8] sm:$0xff] %vm38_vm2, %v410_v18  ;;  %s411_s3 = smov [#allocation9]  }
  0x18   :  { %332 = vmatprep.subr.msk.bf16.mxu0 %vm325_vm1, %v330_v6  ;;  %45 = vst.msk [vmem:[#allocation5] sm:$0xff] %vm38_vm2, %v410_v18  ;;  %46 = vst.msk [vmem:[#allocation5 + $0x8] sm:$0xff] %vm38_vm2, %v410_v18  ;;  %s284_s14 = sshll.u32 %s411_s3, 4  ;;  %s285_s14 = int_to_ptr.vmem [resolvable:$true] %s284_s14 }
  0x19   :  { %s379_s15 = scalar_lea.vmem %s285_s14, 256  ;;  %p384_p9 = scmp.lt.s32.totalorder %s285_s14, %s285_s14 }
  0x1a   :  { %p380_p8 = scmp.ne.s32.totalorder %s285_s14, %s379_s15  ;;  %p385_p10 = scmp.lt.s32.totalorder %s379_s15, %s379_s15 }
  0x1c   :  { %v489_v19 = vld [vmem:[#allocation2] sm:$0xff]  ;;  %v492_v22 = vld [vmem:[#allocation2 + $0x8] sm:$0xff]  ;;  %p386_p11 = por %p385_p10, %p384_p9 }
  0x1d   :  { %v212_v46 = vld [vmem:[#allocation4] sm:$0xff] }
  0x1e   :  { %p387_p12 = pnand %p386_p11, %p380_p8 }
  0x1f   :  { %335 = vmatpush3.bf16.xpose.msk.msra.mxu0 %vm325_vm1, %v330_v6 }
  0x26   :  { %322 = vmatmul.mubr.msk.f32.vlgmr.msra.gmra.mrb[0].mxu0 %vm60_vm0, %v48_v7 }
  0xf9   :  { %v323_v11 = vpop.f32.mrb[0].mxu0 }
  0xfa   :  { %v472_v12 = vadd.f32 %v323_v11, %v300_v10  ;;  %v145_v13 = vpop.f32.mrb[1].mxu0 }
  0xfb   :  { %v146_v14 = vadd.f32 %v300_v10, %v145_v13 }
  0xfc   :  { %155 = vst.msk [vmem:[#allocation9 + $0x8] sm:$0xff] %vm60_vm0, %v472_v12  ;;  %v166_v16 = vsel %vm60_vm0, %v472_v12, -inf  ;;  %v239_v50 = vsel %vm60_vm0, %v472_v12, 0.0 }
  0xfd   :  { %154 = vst.msk [vmem:[#allocation9] sm:$0xff] %vm60_vm0, %v146_v14  ;;  %v163_v15 = vsel %vm60_vm0, %v146_v14, -inf  ;;  %v236_v49 = vsel %vm60_vm0, %v146_v14, 0.0 }
  0xfe   :  { %164 = vmax.xlane.f32.xlu0 %v163_v15 }
 0x102   :  { %167 = vmax.xlane.f32.xlu0 %v166_v16 }
 0x118   :  { %215 = vperm.xlu0 %344, %v210_v17  }
 0x18b   :  { %v165_v20 = vpop.xlane.xlu0 %164 }
 0x18c   :  { %v169_v21 = vmax.f32 %v489_v19, %v165_v20 }
 0x18e   :  { %v171_v23 = vsub.f32 %v489_v19, %v169_v21  ;;  %208 = vst.msk [vmem:[#allocation2] sm:$0xff] %vm38_vm2, %v169_v21  ;;  %179 = vperm.xlu1 %343, %v169_v21  }
 0x18f   :  { %v168_v24 = vpop.xlane.xlu0 %167 }
 0x190   :  { %v170_v25 = vmax.f32 %v492_v22, %v168_v24 }
 0x192   :  { %v172_v27 = vsub.f32 %v492_v22, %v170_v25  ;;  %209 = vst.msk [vmem:[#allocation2 + $0x8] sm:$0xff] %vm38_vm2, %v170_v25  ;;  %184 = vperm.xlu1 %343, %v170_v25  }
 0x196   :  { %218 = vperm.xlu1 %343, %v211_v28  }
 0x197   :  { %v216_v30 = vpop.permute.xlu0 %215 }
 0x198   :  { %vm220_vm3 = vcmp.eq.s32.totalorder %v157_v29, %v216_v30 }
 0x199   :  { %v222_v31 = vsel %vm220_vm3, %v146_v14, 0.0 }
 0x19a   :  { %v224_v32 = vsel %vm60_vm0, %v222_v31, 0.0 }
 0x19b   :  { %225 = vadd.xlane.f32.xlu0 %v224_v32 }
 0x20d   :  { %v180_v33 = vpop.permute.xlu1 %179 }
 0x20e   :  { %v187_v34 = vsub.f32 %v146_v14, %v180_v33 }
 0x210   :  { %v189_v35 = vmul.f32 1.442695, %v187_v34 }
 0x211   :  { %v185_v36 = vpop.permute.xlu1 %184 }
 0x212   :  { %345 = vpow2.f32 %v189_v35  ;;  %v188_v37 = vsub.f32 %v472_v12, %v185_v36 }
 0x214   :  { %v191_v38 = vmul.f32 1.442695, %v188_v37 }
 0x215   :  { %v219_v40 = vpop.permute.xlu1 %218 }
 0x216   :  { %347 = vpow2.f32 %v191_v38  ;;  %vm221_vm4 = vcmp.eq.s32.totalorder %v157_v29, %v219_v40 }
 0x217   :  { %v223_v44 = vsel %vm221_vm4, %v472_v12, 0.0 }
 0x218   :  { %v227_v45 = vsel %vm60_vm0, %v223_v44, 0.0 }
 0x21c   :  { %v346_v39 = vpop.eup %345 }
 0x21d   :  { %v197_v41 = vsel %vm60_vm0, %v346_v39, 0.0 }
 0x21e   :  { %198 = vadd.xlane.f32.xlu1 %v197_v41 }
 0x220   :  { %v348_v42 = vpop.eup %347 }
 0x221   :  { %v200_v43 = vsel %vm60_vm0, %v348_v42, 0.0 }
 0x222   :  { %201 = vadd.xlane.f32.xlu1 %v200_v43 }
 0x226   :  { %228 = vadd.xlane.f32.xlu1 %v227_v45 }
 0x228   :  { %v226_v47 = vpop.xlane.xlu0 %225 }
 0x229   :  { %v230_v48 = vadd.f32 %v226_v47, %v212_v46 }
 0x22a   :  { %237 = vadd.xlane.f32.xlu1 %v236_v49 }
 0x22b   :  { %232 = vst.msk [vmem:[#allocation4] sm:$0xff] %vm38_vm2, %v230_v48 }
 0x22e   :  { %240 = vadd.xlane.f32.xlu1 %v239_v50 }
 0x22f   :  { %390 = shalt.err (!%p387_p12)
}
 0x230   :  { %s391_s18 = scalar_lea.hbm %s544_s4, 256 }
 0x231   :  { %p392_p13 = scmp.ne.s32.totalorder %s544_s4, %s391_s18  ;;  %p395_p0 = scmp.lt.u32.totalorder %s391_s18, %s544_s4 }
 0x233   :  { %p397_p1 = pnand %p395_p0, %p392_p13 }
 0x235   :  { %400 = shalt.err (!%p397_p1)
}
 0x236   :  { %290 = dma.vmem_to_hbm [thread:$0]  %s285_s14, 256, %s544_s4, [#allocation8], %s406_s28, %s406_s28, %s407_s29   ;;  %v173_v51 = vmul.f32 1.442695, %v171_v23  ;;  %v175_v52 = vmul.f32 1.442695, %v172_v27 }
 0x237   :  { %v193_v54 = vld [vmem:[#allocation3] sm:$0xff]  ;;  %v194_v58 = vld [vmem:[#allocation3 + $0x8] sm:$0xff]  ;;  %v213_v63 = vld [vmem:[#allocation4 + $0x8] sm:$0xff] }
 0x238   :  { %349 = vpow2.f32 %v173_v51  ;;  %v234_v3 = vld [vmem:[#allocation5] sm:$0xff]  ;;  %v235_v7 = vld [vmem:[#allocation5 + $0x8] sm:$0xff]  ;;  %v255_v12 = vld [vmem:[#allocation2] sm:$0xff] }
 0x239   :  { %351 = vpow2.f32 %v175_v52  ;;  %v259_v15 = vld [vmem:[#allocation4] sm:$0xff]  ;;  %v256_v19 = vld [vmem:[#allocation2 + $0x8] sm:$0xff] }
 0x242   :  { %v350_v53 = vpop.eup %349 }
 0x243   :  { %v195_v55 = vmul.f32 %v350_v53, %v193_v54  ;;  %v352_v56 = vpop.eup %351 }
 0x244   :  { %v196_v60 = vmul.f32 %v352_v56, %v194_v58 }
 0x2ab   :  { %v199_v57 = vpop.xlane.xlu1 %198 }
 0x2ac   :  { %v203_v59 = vadd.f32 %v199_v57, %v195_v55 }
 0x2ae   :  { %206 = vst.msk [vmem:[#allocation3] sm:$0xff] %vm38_vm2, %v203_v59 }
 0x2af   :  { %v202_v61 = vpop.xlane.xlu1 %201 }
 0x2b0   :  { %v204_v62 = vadd.f32 %v202_v61, %v196_v60 }
 0x2b2   :  { %207 = vst.msk [vmem:[#allocation3 + $0x8] sm:$0xff] %vm38_vm2, %v204_v62 }
 0x2b3   :  { %v229_v0 = vpop.xlane.xlu1 %228 }
 0x2b4   :  { %v231_v1 = vadd.f32 %v229_v0, %v213_v63 }
 0x2b5   :  { %v249_v2 = vld [vmem:[#allocation3] sm:$0xff] }
 0x2b6   :  { %353 = vlog2.f32 %v249_v2  ;;  %233 = vst.msk [vmem:[#allocation4 + $0x8] sm:$0xff] %vm38_vm2, %v231_v1 }
 0x2b7   :  { %v238_v4 = vpop.xlane.xlu1 %237 }
 0x2b8   :  { %v242_v5 = vadd.f32 %v238_v4, %v234_v3 }
 0x2b9   :  { %v250_v6 = vld [vmem:[#allocation3 + $0x8] sm:$0xff] }
 0x2ba   :  { %355 = vlog2.f32 %v250_v6  ;;  %244 = vst.msk [vmem:[#allocation5] sm:$0xff] %vm38_vm2, %v242_v5 }
 0x2bb   :  { %v241_v8 = vpop.xlane.xlu1 %240 }
 0x2bc   :  { %v243_v9 = vadd.f32 %v241_v8, %v235_v7 }
 0x2bd   :  { %v260_v23 = vld [vmem:[#allocation4 + $0x8] sm:$0xff] }
 0x2be   :  { %245 = vst.msk [vmem:[#allocation5 + $0x8] sm:$0xff] %vm38_vm2, %v243_v9 }
 0x2c0   :  { %v354_v10 = vpop.eup %353 }
 0x2c1   :  { %v252_v11 = vmul.f32 0.6931472, %v354_v10  ;;  %v263_v20 = vld [vmem:[#allocation5] sm:$0xff] }
 0x2c3   :  { %v257_v13 = vadd.f32 %v255_v12, %v252_v11 }
 0x2c4   :  { %v356_v14 = vpop.eup %355 }
 0x2c5   :  { %v254_v16 = vmul.f32 0.6931472, %v356_v14  ;;  %v261_v17 = vsub.f32 %v259_v15, %v257_v13  ;;  %v265_v18 = vmul.f32 32.0, %v257_v13  ;;  %v264_v28 = vld [vmem:[#allocation5 + $0x8] sm:$0xff] }
 0x2c7   :  { %v258_v21 = vadd.f32 %v256_v19, %v254_v16  ;;  %v267_v22 = vsub.f32 %v263_v20, %v265_v18  ;;  %v269_v25 = vmul.f32 0.8967742, %v261_v17 }
 0x2c9   :  { %v262_v24 = vsub.f32 %v260_v23, %v258_v21  ;;  %v271_v26 = vmul.f32 0.0032258064, %v267_v22  ;;  %v266_v27 = vmul.f32 32.0, %v258_v21 }
 0x2cb   :  { %v273_v29 = vadd.f32 %v271_v26, %v269_v25  ;;  %v268_v30 = vsub.f32 %v264_v28, %v266_v27  ;;  %v270_v31 = vmul.f32 0.8967742, %v262_v24 }
 0x2cd   :  { %v275_v32 = vsub.f32 0.0, %v273_v29  ;;  %v272_v33 = vmul.f32 0.0032258064, %v268_v30 }
 0x2cf   :  { %277 = vst.msk [vmem:[%s545_s5] sm:$0xff] %vm38_vm2, %v275_v32  ;;  %v274_v34 = vadd.f32 %v272_v33, %v270_v31 }
 0x2d1   :  { %v276_v35 = vsub.f32 0.0, %v274_v34 }
 0x2d3   :  { %278 = vst.msk [vmem:[%s545_s5 + $0x8] sm:$0xff] %vm38_vm2, %v276_v35 }
 0x2d4   :  { %403 = dma.done.wait [#allocation8], 256  }
 0x2d5   :  { %404 = vsyncadd [#allocation8], 4294967040 }
 0x2d6   :  { %298 = vsyncpa [#allocation7], 1 }
 0x2d7   :  { %299 = vsyncpa [#allocation8], 1 }

</bundles_post_ra>
